<compile_context>
chip_gen: v6e
topology: v6e:2x2x1
jax: 0.10.0
libtpu: 0.0.40
codegen_flags: <defaults>
</compile_context>

<pallas_src>
import functools
import math

import jax
import jax.numpy as jnp
from jax.experimental import pallas as pl
from jax.experimental.pallas import tpu as pltpu


# ----------------------------------------------------------------------------
# Fast path: K divides 128.  Block layout (row_tile, 128); each group of K
# consecutive lanes is one sample's K prototype distances.
# ----------------------------------------------------------------------------
def _seg_softmax_kernel(d_ref, o_ref, *, alpha: float, beta: float, k: int):
    d = d_ref[...].astype(jnp.float32)                    # (rt, 128)
    lanes = d.shape[-1]                                   # 128

    # exp(-alpha * d) + 1e-8 computed first so `d` can die early (VMEM liveness).
    e_dist = jnp.exp((-alpha) * d) + 1e-8
    logits = (-beta) * d

    # Position of each lane inside its K-wide segment (K is a power of two).
    pos = jax.lax.broadcasted_iota(jnp.int32, d.shape, 1) & (k - 1)

    def seg_allreduce(x, combine):
        # Recursive-doubling all-reduce confined to K-lane segments.
        # Within-segment circular rotation by s = select(roll(s), roll(s-K)).
        s = 1
        while s < k:
            fwd = pltpu.roll(x, shift=s, axis=1)               # x[i - s]
            wrap = pltpu.roll(x, shift=(s - k) % lanes, axis=1)  # x[i - s + K]
            x = combine(x, jnp.where(pos >= s, fwd, wrap))
            s *= 2
        return x

    # Numerically stable softmax(-beta * d) within each K-lane segment.
    m = seg_allreduce(logits, jnp.maximum)
    e = jnp.exp(logits - m)
    denom = seg_allreduce(e, jnp.add)
    softmax = e * pl.reciprocal(denom, approx=True)       # EUP slot, ~free

    o_ref[...] = (softmax * e_dist).astype(o_ref.dtype)


# ----------------------------------------------------------------------------
# Fallback: arbitrary K.  Natural (rows, K) layout, reduce along the last axis.
# ----------------------------------------------------------------------------
def _rowwise_softmax_kernel(d_ref, o_ref, *, alpha: float, beta: float):
    d = d_ref[...].astype(jnp.float32)                    # (rt, K)
    e_dist = jnp.exp((-alpha) * d) + 1e-8
    logits = (-beta) * d
    m = jnp.max(logits, axis=-1, keepdims=True)
    e = jnp.exp(logits - m)
    denom = jnp.sum(e, axis=-1, keepdims=True)
    softmax = e * pl.reciprocal(denom, approx=True)
    o_ref[...] = (softmax * e_dist).astype(o_ref.dtype)


@functools.partial(jax.jit, static_argnames=("alpha", "beta", "row_tile"))
def distance_layer(distances: jax.Array, alpha: float = 0.1, beta: float = 1e6,
                   row_tile: int = 4096) -> jax.Array:
    """DistanceLayer.forward along the last axis of `distances` (any leading dims)."""
    orig_shape = distances.shape
    orig_dtype = distances.dtype
    k = int(orig_shape[-1])
    rows = math.prod(orig_shape[:-1]) if len(orig_shape) > 1 else 1
    total = rows * k

    compiler_params = pltpu.CompilerParams(
        dimension_semantics=("parallel",),          # independent samples
        vmem_limit_bytes=48 * 1024 * 1024,          # fits v5e/v6e/v7x
    )

    fast = (total > 0) and (k <= 128) and (128 % k == 0) and (total % 128 == 0)

    if fast:
        # Free metadata reshape: contiguous (…, K) -> (total/128, 128).
        n_srows = total // 128
        rt = max(8, (int(row_tile) // 8) * 8)
        if n_srows <= rt:
            rt = n_srows                            # single full-extent block
        grid = (pl.cdiv(n_srows, rt),)              # partial last block is OK

        d2 = distances.reshape(n_srows, 128)
        kern = functools.partial(_seg_softmax_kernel,
                                 alpha=float(alpha), beta=float(beta), k=k)
        out2 = pl.pallas_call(
            kern,
            out_shape=jax.ShapeDtypeStruct((n_srows, 128), orig_dtype),
            grid_spec=pltpu.PrefetchScalarGridSpec(
                num_scalar_prefetch=0,
                grid=grid,
                in_specs=[pl.BlockSpec((rt, 128), lambda i: (i, 0))],
                out_specs=pl.BlockSpec((rt, 128), lambda i: (i, 0)),
            ),
            compiler_params=compiler_params,
        )(d2)
        return out2.reshape(orig_shape)

    # ---- generic-K fallback (K does not divide 128) -------------------------
    d2 = distances.reshape(rows, k)
    lane_k = max(k, 128)                            # VMEM lane padding of K
    rt = max(8, min(4096, (2 << 20) // (lane_k * 4)))
    rt = (rt // 8) * 8
    if rows <= rt:
        rt = rows                                   # full-extent block
    grid = (pl.cdiv(rows, rt),)

    kern = functools.partial(_rowwise_softmax_kernel,
                             alpha=float(alpha), beta=float(beta))
    out2 = pl.pallas_call(
        kern,
        out_shape=jax.ShapeDtypeStruct((rows, k), orig_dtype),
        grid_spec=pltpu.PrefetchScalarGridSpec(
            num_scalar_prefetch=0,
            grid=grid,
            in_specs=[pl.BlockSpec((rt, k), lambda i: (i, 0))],
            out_specs=pl.BlockSpec((rt, k), lambda i: (i, 0)),
        ),
        compiler_params=compiler_params,
    )(d2)
    return out2.reshape(orig_shape)


def _reference(distances, alpha=0.1, beta=1e6):
    d = distances.astype(jnp.float32)
    sm = jax.nn.softmax(-d * beta, axis=-1)
    return (sm * (jnp.exp(-alpha * d) + 1e-8)).astype(distances.dtype)


if __name__ == "__main__":
    key = jax.random.PRNGKey(0)
    k0, k1, k2, k3 = jax.random.split(key, 4)

    # 1) Main example: (batch=2, seq=8, k_protos=16), f32 -> fast path, 1 block.
    d_main = jax.random.uniform(k0, (2, 8, 16), dtype=jnp.float32,
                                minval=0.0, maxval=4.0)
    out = jax.block_until_ready(distance_layer(d_main, alpha=0.1, beta=1e6))
    ref = _reference(d_main)
    assert out.shape == d_main.shape and out.dtype == d_main.dtype
    assert jnp.allclose(out, ref, atol=1e-5, rtol=5e-3), "main case mismatch"

    # 2) Multiple grid steps + partial last block on the fast path.
    d_multi = jax.random.uniform(k1, (4, 96, 16), dtype=jnp.float32,
                                 minval=0.0, maxval=4.0)
    out2 = jax.block_until_ready(distance_layer(d_multi, alpha=0.1, beta=1e6,
                                                row_tile=40))
    assert jnp.allclose(out2, _reference(d_multi), atol=1e-5, rtol=5e-3), \
        "multi-block case mismatch"

    # 3) bf16 I/O on the fast path.
    d_bf16 = jax.random.uniform(k2, (2, 64, 16), dtype=jnp.float32,
                                minval=0.0, maxval=4.0).astype(jnp.bfloat16)
    out3 = jax.block_until_ready(distance_layer(d_bf16, alpha=0.1, beta=1e6))
    assert out3.dtype == jnp.bfloat16
    assert jnp.allclose(out3.astype(jnp.float32),
                        _reference(d_bf16).astype(jnp.float32),
                        atol=1e-3, rtol=3e-2), "bf16 case mismatch"

    # 4) Generic-K fallback (K=10 does not divide 128).
    d_fb = jax.random.uniform(k3, (3, 37, 10), dtype=jnp.float32,
                              minval=0.0, maxval=4.0)
    out4 = jax.block_until_ready(distance_layer(d_fb, alpha=0.1, beta=1e6))
    assert jnp.allclose(out4, _reference(d_fb), atol=1e-5, rtol=5e-3), \
        "fallback case mismatch"

    print("KERNEL_OK")
</pallas_src>

<mosaic_0001>
module attributes {stable_mosaic.version = 11 : i64} {
  func.func @_seg_softmax_kernel(%arg0: i32, %arg1: memref<2x128xf32, #tpu.memory_space<vmem>>, %arg2: memref<2x128xf32, #tpu.memory_space<vmem>>) attributes {dimension_semantics = [#tpu.dimension_semantics<parallel>], iteration_bounds = array<i64: 1>, scalar_prefetch = 0 : i64, scratch_operands = 0 : i64, tpu.core_type = #tpu.core_type<tc>, window_params = [{transform_indices = @transform_0, window_bounds = array<i64: 2, 128>}, {transform_indices = @transform_1, window_bounds = array<i64: 2, 128>}]} {
    %c0 = arith.constant 0 : index
    %c0_0 = arith.constant 0 : index
    %0 = vector.load %arg1[%c0, %c0_0] : memref<2x128xf32, #tpu.memory_space<vmem>>, vector<2x128xf32>
    %cst = arith.constant -1.000000e-01 : f32
    %1 = vector.broadcast %cst : f32 to vector<2x128xf32>
    %2 = arith.mulf %1, %0 : vector<2x128xf32>
    %3 = math.exp %2 : vector<2x128xf32>
    %cst_1 = arith.constant 9.99999993E-9 : f32
    %4 = vector.broadcast %cst_1 : f32 to vector<2x128xf32>
    %5 = arith.addf %3, %4 : vector<2x128xf32>
    %cst_2 = arith.constant -1.000000e+06 : f32
    %6 = vector.broadcast %cst_2 : f32 to vector<2x128xf32>
    %7 = arith.mulf %6, %0 : vector<2x128xf32>
    %8 = tpu.iota {dimensions = array<i32: 1>} : vector<2x128xi32>
    %c15_i32 = arith.constant 15 : i32
    %9 = vector.broadcast %c15_i32 : i32 to vector<2x128xi32>
    %10 = arith.andi %8, %9 : vector<2x128xi32>
    %c1_i32 = arith.constant 1 : i32
    %11 = tpu.dynamic_rotate %7 by %c1_i32 dim 1 : vector<2x128xf32>, i32 -> vector<2x128xf32>
    %c113_i32 = arith.constant 113 : i32
    %12 = tpu.dynamic_rotate %7 by %c113_i32 dim 1 : vector<2x128xf32>, i32 -> vector<2x128xf32>
    %c1_i32_3 = arith.constant 1 : i32
    %13 = vector.broadcast %c1_i32_3 : i32 to vector<2x128xi32>
    %14 = arith.cmpi sge, %10, %13 : vector<2x128xi32>
    %15 = arith.select %14, %11, %12 : vector<2x128xi1>, vector<2x128xf32>
    %16 = arith.maximumf %7, %15 : vector<2x128xf32>
    %c2_i32 = arith.constant 2 : i32
    %17 = tpu.dynamic_rotate %16 by %c2_i32 dim 1 : vector<2x128xf32>, i32 -> vector<2x128xf32>
    %c114_i32 = arith.constant 114 : i32
    %18 = tpu.dynamic_rotate %16 by %c114_i32 dim 1 : vector<2x128xf32>, i32 -> vector<2x128xf32>
    %c2_i32_4 = arith.constant 2 : i32
    %19 = vector.broadcast %c2_i32_4 : i32 to vector<2x128xi32>
    %20 = arith.cmpi sge, %10, %19 : vector<2x128xi32>
    %21 = arith.select %20, %17, %18 : vector<2x128xi1>, vector<2x128xf32>
    %22 = arith.maximumf %16, %21 : vector<2x128xf32>
    %c4_i32 = arith.constant 4 : i32
    %23 = tpu.dynamic_rotate %22 by %c4_i32 dim 1 : vector<2x128xf32>, i32 -> vector<2x128xf32>
    %c116_i32 = arith.constant 116 : i32
    %24 = tpu.dynamic_rotate %22 by %c116_i32 dim 1 : vector<2x128xf32>, i32 -> vector<2x128xf32>
    %c4_i32_5 = arith.constant 4 : i32
    %25 = vector.broadcast %c4_i32_5 : i32 to vector<2x128xi32>
    %26 = arith.cmpi sge, %10, %25 : vector<2x128xi32>
    %27 = arith.select %26, %23, %24 : vector<2x128xi1>, vector<2x128xf32>
    %28 = arith.maximumf %22, %27 : vector<2x128xf32>
    %c8_i32 = arith.constant 8 : i32
    %29 = tpu.dynamic_rotate %28 by %c8_i32 dim 1 : vector<2x128xf32>, i32 -> vector<2x128xf32>
    %c120_i32 = arith.constant 120 : i32
    %30 = tpu.dynamic_rotate %28 by %c120_i32 dim 1 : vector<2x128xf32>, i32 -> vector<2x128xf32>
    %c8_i32_6 = arith.constant 8 : i32
    %31 = vector.broadcast %c8_i32_6 : i32 to vector<2x128xi32>
    %32 = arith.cmpi sge, %10, %31 : vector<2x128xi32>
    %33 = arith.select %32, %29, %30 : vector<2x128xi1>, vector<2x128xf32>
    %34 = arith.maximumf %28, %33 : vector<2x128xf32>
    %35 = arith.subf %7, %34 : vector<2x128xf32>
    %36 = math.exp %35 : vector<2x128xf32>
    %c1_i32_7 = arith.constant 1 : i32
    %37 = tpu.dynamic_rotate %36 by %c1_i32_7 dim 1 : vector<2x128xf32>, i32 -> vector<2x128xf32>
    %c113_i32_8 = arith.constant 113 : i32
    %38 = tpu.dynamic_rotate %36 by %c113_i32_8 dim 1 : vector<2x128xf32>, i32 -> vector<2x128xf32>
    %c1_i32_9 = arith.constant 1 : i32
    %39 = vector.broadcast %c1_i32_9 : i32 to vector<2x128xi32>
    %40 = arith.cmpi sge, %10, %39 : vector<2x128xi32>
    %41 = arith.select %40, %37, %38 : vector<2x128xi1>, vector<2x128xf32>
    %42 = arith.addf %36, %41 : vector<2x128xf32>
    %c2_i32_10 = arith.constant 2 : i32
    %43 = tpu.dynamic_rotate %42 by %c2_i32_10 dim 1 : vector<2x128xf32>, i32 -> vector<2x128xf32>
    %c114_i32_11 = arith.constant 114 : i32
    %44 = tpu.dynamic_rotate %42 by %c114_i32_11 dim 1 : vector<2x128xf32>, i32 -> vector<2x128xf32>
    %c2_i32_12 = arith.constant 2 : i32
    %45 = vector.broadcast %c2_i32_12 : i32 to vector<2x128xi32>
    %46 = arith.cmpi sge, %10, %45 : vector<2x128xi32>
    %47 = arith.select %46, %43, %44 : vector<2x128xi1>, vector<2x128xf32>
    %48 = arith.addf %42, %47 : vector<2x128xf32>
    %c4_i32_13 = arith.constant 4 : i32
    %49 = tpu.dynamic_rotate %48 by %c4_i32_13 dim 1 : vector<2x128xf32>, i32 -> vector<2x128xf32>
    %c116_i32_14 = arith.constant 116 : i32
    %50 = tpu.dynamic_rotate %48 by %c116_i32_14 dim 1 : vector<2x128xf32>, i32 -> vector<2x128xf32>
    %c4_i32_15 = arith.constant 4 : i32
    %51 = vector.broadcast %c4_i32_15 : i32 to vector<2x128xi32>
    %52 = arith.cmpi sge, %10, %51 : vector<2x128xi32>
    %53 = arith.select %52, %49, %50 : vector<2x128xi1>, vector<2x128xf32>
    %54 = arith.addf %48, %53 : vector<2x128xf32>
    %c8_i32_16 = arith.constant 8 : i32
    %55 = tpu.dynamic_rotate %54 by %c8_i32_16 dim 1 : vector<2x128xf32>, i32 -> vector<2x128xf32>
    %c120_i32_17 = arith.constant 120 : i32
    %56 = tpu.dynamic_rotate %54 by %c120_i32_17 dim 1 : vector<2x128xf32>, i32 -> vector<2x128xf32>
    %c8_i32_18 = arith.constant 8 : i32
    %57 = vector.broadcast %c8_i32_18 : i32 to vector<2x128xi32>
    %58 = arith.cmpi sge, %10, %57 : vector<2x128xi32>
    %59 = arith.select %58, %55, %56 : vector<2x128xi1>, vector<2x128xf32>
    %60 = arith.addf %54, %59 : vector<2x128xf32>
    %61 = tpu.reciprocal %60 {approx = true} : vector<2x128xf32> -> vector<2x128xf32>
    %62 = arith.mulf %36, %61 : vector<2x128xf32>
    %63 = arith.mulf %62, %5 : vector<2x128xf32>
    %c0_19 = arith.constant 0 : index
    %c0_20 = arith.constant 0 : index
    %64 = vector.load %arg2[%c0_19, %c0_20] : memref<2x128xf32, #tpu.memory_space<vmem>>, vector<2x128xf32>
    tpu.vector_store %arg2[%c0_19, %c0_20], %63 {strides = array<i32>} : memref<2x128xf32, #tpu.memory_space<vmem>>, vector<2x128xf32>,
    return
  }
  func.func @transform_0(%arg0: i32) -> (i32, i32) {
    %c0_i32 = arith.constant 0 : i32
    %c0_i32_0 = arith.constant 0 : i32
    return %arg0, %c0_i32 : i32, i32
  }
  func.func @transform_1(%arg0: i32) -> (i32, i32) {
    %c0_i32 = arith.constant 0 : i32
    %c0_i32_0 = arith.constant 0 : i32
    return %arg0, %c0_i32 : i32, i32
  }
}

</mosaic_0001>

<bundles_post_ra>
// kernel: distance_layer.1
= control target key start
LH: loop header
LB: loop body
LE: loop exit
PB: predicated region body
PF: predicated region fallthrough
CT: control target
= control target key end

     0   :  { %s94_s8 = smov 1   ;;  %s95_s9 = smov 113   ;;  %v14_v2 = vlaneseq  ;;  %s160_s0 = inlined_call_operand.vmem [shape: f32[2,128], index: 0, kind: input, shape index: {}]   ;;  %s161_s1 = inlined_call_operand.vmem [shape: f32[2,128], index: 1, kind: output, shape index: {}]  }
   0x1   :  { %v115_v0 = vld [vmem:[%s160_s0] sm:$0x3]  ;;  %s96_s0 = smov 2   ;;  %s97_s10 = smov 114  }
   0x2   :  { %v13_v1 = vmul.f32 -1000000.0, %v115_v0  ;;  %v15_v3 = vand.u32 127, %v14_v2  ;;  %s98_s11 = smov 116   ;;  %s99_s12 = smov 4  }
   0x3   :  { %s100_s13 = smov 120   ;;  %s101_s14 = smov 8   ;;  %v9_v36 = vmul.f32 -0.1, %v115_v0 }
   0x4   :  { %17 = vrot.lane.b32.xlu0 %v13_v1, %s94_s8  ;;  %v120_v4 = vand.u32 15, %v15_v3 }
   0x5   :  { %v10_v37 = vmul.f32 1.442695, %v9_v36 }
   0x6   :  { %vm21_vm0 = vcmp.ge.s32.totalorder %v120_v4, 1  ;;  %vm28_vm1 = vcmp.ge.s32.totalorder %v120_v4, 2  ;;  %vm35_vm2 = vcmp.ge.s32.totalorder %v120_v4, 4  ;;  %vm42_vm3 = vcmp.ge.s32.totalorder %v120_v4, 8 }
   0x8   :  { %19 = vrot.lane.b32.xlu0 %v13_v1, %s95_s9 }
  0x76   :  { %v18_v5 = vpop.permute.xlu0 %17 }
  0x7a   :  { %v20_v6 = vpop.permute.xlu0 %19 }
  0x7b   :  { %v22_v7 = vsel %vm21_vm0, %v18_v5, %v20_v6 }
  0x7c   :  { %v23_v8 = vmax.f32 %v13_v1, %v22_v7 }
  0x7e   :  { %24 = vrot.lane.b32.xlu1 %v23_v8, %s96_s0 }
  0x82   :  { %26 = vrot.lane.b32.xlu1 %v23_v8, %s97_s10 }
  0xf0   :  { %v25_v9 = vpop.permute.xlu1 %24 }
  0xf4   :  { %v27_v10 = vpop.permute.xlu1 %26 }
  0xf5   :  { %v29_v11 = vsel %vm28_vm1, %v25_v9, %v27_v10 }
  0xf6   :  { %v30_v12 = vmax.f32 %v23_v8, %v29_v11 }
  0xf8   :  { %33 = vrot.lane.b32.xlu1 %v30_v12, %s98_s11  ;;  %31 = vrot.lane.b32.xlu0 %v30_v12, %s99_s12 }
 0x16a   :  { %v34_v13 = vpop.permute.xlu1 %33  ;;  %v32_v14 = vpop.permute.xlu0 %31 }
 0x16b   :  { %v36_v15 = vsel %vm35_vm2, %v32_v14, %v34_v13 }
 0x16c   :  { %v37_v16 = vmax.f32 %v30_v12, %v36_v15 }
 0x16e   :  { %40 = vrot.lane.b32.xlu1 %v37_v16, %s100_s13  ;;  %38 = vrot.lane.b32.xlu0 %v37_v16, %s101_s14 }
 0x1e0   :  { %v41_v17 = vpop.permute.xlu1 %40  ;;  %v39_v18 = vpop.permute.xlu0 %38 }
 0x1e1   :  { %v43_v19 = vsel %vm42_vm3, %v39_v18, %v41_v17 }
 0x1e2   :  { %v44_v20 = vmax.f32 %v37_v16, %v43_v19 }
 0x1e4   :  { %v45_v21 = vsub.f32 %v13_v1, %v44_v20 }
 0x1e6   :  { %v46_v22 = vmul.f32 1.442695, %v45_v21 }
 0x1e8   :  { %88 = vpow2.f32 %v46_v22 }
 0x1e9   :  { %90 = vpow2.f32 %v10_v37 }
 0x1f5   :  { %v89_v23 = vpop.eup %88 }
 0x1f6   :  { %50 = vrot.lane.b32.xlu1 %v89_v23, %s95_s9  ;;  %48 = vrot.lane.b32.xlu0 %v89_v23, %s94_s8  ;;  %v91_v42 = vpop.eup %90 }
 0x1f7   :  { %v12_v43 = vadd.f32 1e-08, %v91_v42 }
 0x268   :  { %v51_v24 = vpop.permute.xlu1 %50  ;;  %v49_v25 = vpop.permute.xlu0 %48 }
 0x269   :  { %v52_v26 = vsel %vm21_vm0, %v49_v25, %v51_v24 }
 0x26a   :  { %v53_v27 = vadd.f32 %v89_v23, %v52_v26 }
 0x26c   :  { %56 = vrot.lane.b32.xlu1 %v53_v27, %s97_s10  ;;  %54 = vrot.lane.b32.xlu0 %v53_v27, %s96_s0 }
 0x2de   :  { %v57_v28 = vpop.permute.xlu1 %56  ;;  %v55_v29 = vpop.permute.xlu0 %54 }
 0x2df   :  { %v58_v30 = vsel %vm28_vm1, %v55_v29, %v57_v28 }
 0x2e0   :  { %v59_v31 = vadd.f32 %v58_v30, %v53_v27 }
 0x2e2   :  { %62 = vrot.lane.b32.xlu1 %v59_v31, %s98_s11  ;;  %60 = vrot.lane.b32.xlu0 %v59_v31, %s99_s12 }
 0x354   :  { %v63_v32 = vpop.permute.xlu1 %62  ;;  %v61_v33 = vpop.permute.xlu0 %60 }
 0x355   :  { %v64_v34 = vsel %vm35_vm2, %v61_v33, %v63_v32 }
 0x356   :  { %v65_v35 = vadd.f32 %v64_v34, %v59_v31 }
 0x358   :  { %68 = vrot.lane.b32.xlu1 %v65_v35, %s100_s13  ;;  %66 = vrot.lane.b32.xlu0 %v65_v35, %s101_s14 }
 0x3ca   :  { %v69_v38 = vpop.permute.xlu1 %68  ;;  %v67_v39 = vpop.permute.xlu0 %66 }
 0x3cb   :  { %v70_v40 = vsel %vm42_vm3, %v67_v39, %v69_v38 }
 0x3cc   :  { %v71_v41 = vadd.f32 %v70_v40, %v65_v35 }
 0x3ce   :  { %92 = vrcp.f32 %v71_v41 }
 0x3db   :  { %v93_v44 = vpop.eup %92 }
 0x3dc   :  { %v73_v45 = vmul.f32 %v93_v44, %v89_v23 }
 0x3de   :  { %v74_v46 = vmul.f32 %v73_v45, %v12_v43 }
 0x3e0   :  { %75 = vst [vmem:[%s161_s1] sm:$0x3] %v74_v46 }

</bundles_post_ra>
